<compile_context>
chip_gen: v5e
topology: v5e:2x2
jax: 0.10.0
libtpu: 0.0.40
codegen_flags: <defaults>
</compile_context>

<pallas_src>
import functools

import jax
import jax.numpy as jnp
from jax import lax
from jax.experimental import pallas as pl
from jax.experimental.pallas import tpu as pltpu


_LANES = 128
_CAND_BLOCK = 32        # candidates fake-quantized per grid step (static unroll)
_MAX_TILE_ROWS = 4096   # (4096, 128) f32 tile = 2 MiB; 4 MiB double-buffered


@functools.lru_cache(maxsize=1)
def _cand_axis_semantics():
    """On v7x, genuinely split the candidate axis across the two TensorCores."""
    try:
        kind = jax.devices()[0].device_kind.lower()
    except Exception:  # pragma: no cover - defensive
        kind = ""
    return pltpu.CORE_PARALLEL if "v7" in kind else pltpu.PARALLEL


# -----------------------------------------------------------------------------
# Slab preparation (flatten -> zero-padded (rows, 128) slab, rows % tile_r == 0)
# -----------------------------------------------------------------------------
def _slab_geometry(numel):
    rows = max(8, -(-numel // _LANES))
    rows = -(-rows // 8) * 8
    tile_r = min(_MAX_TILE_ROWS, rows)
    rows = -(-rows // tile_r) * tile_r
    return rows, tile_r


def _to_slab(x):
    flat = jnp.reshape(x, (-1,)).astype(jnp.float32)
    numel = flat.shape[0]
    rows, _ = _slab_geometry(numel)
    flat = jnp.pad(flat, (0, rows * _LANES - numel))  # zero padding (MSE-neutral)
    return flat.reshape(rows, _LANES), numel


# -----------------------------------------------------------------------------
# Pallas kernels
# -----------------------------------------------------------------------------
def _aminmax_kernel(x_ref, min_ref, max_ref, *, tile_r, numel):
    """Lane-wise (1,128) running min/max over the data-tile grid; the padded
    tail (flat index >= numel) is masked with +/-inf."""
    d = pl.program_id(0)

    @pl.when(d == 0)
    def _():
        min_ref[...] = jnp.full_like(min_ref, jnp.inf)
        max_ref[...] = jnp.full_like(max_ref, -jnp.inf)

    x = x_ref[...]                                            # (tile_r, 128)
    row = lax.broadcasted_iota(jnp.int32, x.shape, 0)
    col = lax.broadcasted_iota(jnp.int32, x.shape, 1)
    flat_idx = (d * tile_r + row) * _LANES + col
    valid = flat_idx < numel
    x_lo = jnp.where(valid, x, jnp.inf)
    x_hi = jnp.where(valid, x, -jnp.inf)
    min_ref[...] = jnp.minimum(min_ref[...],
                               jnp.min(x_lo, axis=0, keepdims=True))
    max_ref[...] = jnp.maximum(max_ref[...],
                               jnp.max(x_hi, axis=0, keepdims=True))


def _mse_scores_kernel(scale_ref, zp_ref, inv_ref, x_ref, out_ref,
                       *, qmin, qmax, cb):
    """For each of `cb` candidates (scale / zero_point / inv_scale read as
    scalars from SMEM and splatted), accumulate the lane-wise
    sum((fake_quant(x) - x)^2) over the inner data-tile grid axis.

    Zero-padded elements fake-quantize with exactly zero error (zero_point is
    an integer inside [qmin, qmax]), so no tail mask is needed here.
    """
    c = pl.program_id(0)
    d = pl.program_id(1)

    @pl.when(d == 0)
    def _():
        out_ref[...] = jnp.zeros_like(out_ref)

    x = x_ref[...]                      # (tile_r, 128) f32
    base = c * cb
    partials = []
    for k in range(cb):                 # static unroll over the candidate block
        s = scale_ref[base + k]
        z = zp_ref[base + k]
        inv = inv_ref[base + k]
        # torch.fake_quantize_per_tensor_affine semantics:
        #   q  = clamp(nearbyint(x * inv_scale + zero_point), qmin, qmax)
        #   xq = (q - zero_point) * scale
        q = jnp.clip(jnp.round(x * inv + z), qmin, qmax)
        dq = (q - z) * s - x
        partials.append(jnp.sum(dq * dq, axis=0, keepdims=True))  # (1, 128)

    # single (cb, 128) accumulate per grid step (no per-candidate masked RMWs)
    out_ref[...] += jnp.concatenate(partials, axis=0)


# -----------------------------------------------------------------------------
# pallas_call wrappers
# -----------------------------------------------------------------------------
def _pallas_aminmax(x2d, tile_r, numel):
    rows = x2d.shape[0]
    kernel = functools.partial(_aminmax_kernel, tile_r=tile_r, numel=numel)
    mn, mx = pl.pallas_call(
        kernel,
        out_shape=(jax.ShapeDtypeStruct((1, _LANES), jnp.float32),
                   jax.ShapeDtypeStruct((1, _LANES), jnp.float32)),
        grid=(rows // tile_r,),
        in_specs=[pl.BlockSpec((tile_r, _LANES), lambda d: (d, 0))],
        out_specs=(pl.BlockSpec((1, _LANES), lambda d: (0, 0)),
                   pl.BlockSpec((1, _LANES), lambda d: (0, 0))),
        compiler_params=pltpu.CompilerParams(
            dimension_semantics=(pltpu.ARBITRARY,)),
    )(x2d)
    return jnp.min(mn), jnp.max(mx)


def _pallas_mse_scores(x2d, tile_r, scale, zero_point, inv_scale, qmin, qmax):
    rows = x2d.shape[0]
    n_pad = scale.shape[0]
    kernel = functools.partial(_mse_scores_kernel, qmin=float(qmin),
                               qmax=float(qmax), cb=_CAND_BLOCK)
    return pl.pallas_call(
        kernel,
        out_shape=jax.ShapeDtypeStruct((n_pad, _LANES), jnp.float32),
        grid_spec=pltpu.PrefetchScalarGridSpec(
            num_scalar_prefetch=3,     # scale, zero_point, inv_scale -> SMEM
            grid=(n_pad // _CAND_BLOCK, rows // tile_r),
            in_specs=[
                pl.BlockSpec((tile_r, _LANES), lambda c, d, s, z, i: (d, 0)),
            ],
            out_specs=pl.BlockSpec((_CAND_BLOCK, _LANES),
                                   lambda c, d, s, z, i: (c, 0)),
        ),
        compiler_params=pltpu.CompilerParams(
            # candidate axis is independent -> split across TensorCores on v7x;
            # data axis is the accumulation/reduction axis (kept last).
            dimension_semantics=(_cand_axis_semantics(), pltpu.ARBITRARY)),
    )(scale, zero_point, inv_scale, x2d)


# -----------------------------------------------------------------------------
# qparams (vectorized over candidates) — mirrors ObserverBase.calculate_qparams
# -----------------------------------------------------------------------------
def _calc_qparams(new_min, new_max, qmin, qmax, symmetric, eps):
    min_neg = jnp.minimum(new_min, 0.0)
    max_pos = jnp.maximum(new_max, 0.0)
    if symmetric:
        max_pos = jnp.maximum(-min_neg, max_pos)
        scale = max_pos / (float(qmax - qmin) / 2.0)
        scale = jnp.maximum(scale, eps)
        zero_point = jnp.zeros_like(scale)
    else:
        scale = (max_pos - min_neg) / float(qmax - qmin)
        scale = jnp.maximum(scale, eps)
        zero_point = qmin - jnp.round(min_neg / scale)
        zero_point = jnp.clip(zero_point, qmin, qmax)
    return scale, zero_point


# -----------------------------------------------------------------------------
# jitted entry points
# -----------------------------------------------------------------------------
@jax.jit
def _prepare(x):
    """Flatten + pad to the (rows, 128) slab and run the Pallas aminmax once."""
    x2d, numel = _to_slab(x)
    _, tile_r = _slab_geometry(numel)
    mn, mx = _pallas_aminmax(x2d, tile_r, numel)
    return x2d, mn, mx


@functools.partial(jax.jit, static_argnames=("tile_r", "numel", "qmin", "qmax",
                                             "symmetric", "num", "one_side",
                                             "eps"))
def _mse_search(x2d, x_min, x_max, *, tile_r, numel, qmin, qmax, symmetric,
                num, one_side, eps):
    idx = jnp.arange(1, num + 1, dtype=jnp.float32)
    if one_side != "no" or symmetric:
        # perform_1D_search
        xrange = jnp.maximum(jnp.abs(x_min), x_max)
        thres = xrange / num * idx
        cand_min = jnp.zeros_like(thres) if one_side == "pos" else -thres
        cand_max = jnp.zeros_like(thres) if one_side == "neg" else thres
    else:
        # perform_2D_search: outer loop over range steps, inner over zero-points
        xrange = x_max - x_min
        tmp_max = xrange / num * idx                           # (num,)
        tmp_delta = tmp_max / float(qmax - qmin)               # (num,)
        zp = jnp.arange(qmin, qmax + 1, dtype=jnp.float32)     # (nzp,)
        shift = zp[None, :] * tmp_delta[:, None]               # (num, nzp)
        cand_min = jnp.maximum(0.0 - shift, x_min).reshape(-1)
        cand_max = jnp.minimum(tmp_max[:, None] - shift, x_max).reshape(-1)

    n_cand = cand_min.shape[0]
    scale, zero_point = _calc_qparams(cand_min, cand_max, qmin, qmax,
                                      symmetric, eps)
    inv_scale = 1.0 / scale   # exact f32, matches torch's fake_quantize

    # pad the candidate axis to a multiple of the in-kernel candidate block
    n_pad = -(-n_cand // _CAND_BLOCK) * _CAND_BLOCK
    pad = n_pad - n_cand
    scale = jnp.pad(scale, (0, pad), constant_values=1.0)
    zero_point = jnp.pad(zero_point, (0, pad), constant_values=0.0)
    inv_scale = jnp.pad(inv_scale, (0, pad), constant_values=1.0)

    partial = _pallas_mse_scores(x2d, tile_r, scale, zero_point, inv_scale,
                                 qmin, qmax)
    scores = jnp.sum(partial, axis=1)[:n_cand] / float(numel)   # lp_loss mean
    best = jnp.argmin(scores)            # first minimum == torch "score < best"
    return cand_min[best], cand_max[best]


# -----------------------------------------------------------------------------
# Observers (JAX / Pallas)
# -----------------------------------------------------------------------------
class MSEObserver:
    def __init__(self, bit=8, symmetric=False, ch_axis=-1):
        assert ch_axis == -1, "Pallas implementation covers per-tensor (ch_axis=-1)"
        self.bit = bit
        self.symmetric = symmetric
        self.ch_axis = ch_axis
        self.eps = 1e-8
        if self.symmetric:
            self.quant_min = -(2 ** (self.bit - 1))
            self.quant_max = 2 ** (self.bit - 1) - 1
        else:
            self.quant_min = 0
            self.quant_max = 2 ** self.bit - 1
        self.min_val = jnp.array(jnp.inf, jnp.float32)
        self.max_val = jnp.array(-jnp.inf, jnp.float32)
        self.p = 2.0
        self.num = 100
        self.one_side_dist = None

    def _observe(self, x):
        """One min/max pass + one candidate-batched MSE search pass."""
        numel = int(x.size)
        _, tile_r = _slab_geometry(numel)
        x2d, x_min, x_max = _prepare(x)
        if self.one_side_dist is None:
            # one-time host sync to pick the (static) search structure
            self.one_side_dist = ("pos" if float(x_min) >= 0.0
                                  else "neg" if float(x_max) <= 0.0 else "no")
        return _mse_search(x2d, x_min, x_max, tile_r=tile_r, numel=numel,
                           qmin=self.quant_min, qmax=self.quant_max,
                           symmetric=self.symmetric, num=self.num,
                           one_side=self.one_side_dist, eps=self.eps)

    def __call__(self, x_orig, observation_mask=None, seq_pos=-1):
        if x_orig.size == 0:
            return x_orig
        x = jnp.asarray(x_orig, jnp.float32)
        if observation_mask is not None:
            # TODO(synk): remove_padding (variable-length per-sequence gather) not implemented.
            raise NotImplementedError("observation_mask path not implemented")
        best_min, best_max = self._observe(x)
        self.min_val = jnp.minimum(self.min_val, best_min)
        self.max_val = jnp.maximum(self.max_val, best_max)
        return None


class AvgMSEObserver(MSEObserver):
    def __init__(self, bit=8, symmetric=False, ch_axis=-1):
        super().__init__(bit=bit, symmetric=symmetric, ch_axis=ch_axis)
        assert self.ch_axis == -1
        self.cnt = 0

    def __call__(self, x_orig, observation_mask=None, seq_pos=-1):
        if x_orig.size == 0:
            return x_orig
        x = jnp.asarray(x_orig, jnp.float32)
        if observation_mask is not None:
            # TODO(synk): remove_padding (variable-length per-sequence gather) not implemented.
            raise NotImplementedError("observation_mask path not implemented")
        best_min, best_max = self._observe(x)
        if self.cnt == 0:   # mirrors `max_val.numel() <= 1 and max_val.isinf()`
            self.min_val = best_min
            self.max_val = best_max
        else:
            self.min_val = self.min_val * self.cnt + best_min
            self.max_val = self.max_val * self.cnt + best_max
        self.cnt += 1
        self.min_val = self.min_val / self.cnt
        self.max_val = self.max_val / self.cnt
        return None


# -----------------------------------------------------------------------------
if __name__ == "__main__":
    key = jax.random.PRNGKey(0)
    # NCHW activation (like a PyTorch conv output): batch=2, channels=4, 16x16
    x = jax.random.normal(key, (2, 4, 16, 16), dtype=jnp.float32)

    obs = AvgMSEObserver(bit=8, symmetric=False, ch_axis=-1)
    obs(x)

    jax.block_until_ready(obs.min_val)
    jax.block_until_ready(obs.max_val)
    print("KERNEL_OK")
</pallas_src>

<mosaic_0001>
module attributes {stable_mosaic.version = 11 : i64} {
  func.func @_aminmax_kernel(%arg0: i32, %arg1: memref<16x128xf32, #tpu.memory_space<vmem>>, %arg2: memref<1x128xf32, #tpu.memory_space<vmem>>, %arg3: memref<1x128xf32, #tpu.memory_space<vmem>>) attributes {dimension_semantics = [#tpu.dimension_semantics<arbitrary>], iteration_bounds = array<i64: 1>, scalar_prefetch = 0 : i64, scratch_operands = 0 : i64, tpu.core_type = #tpu.core_type<tc>, window_params = [{transform_indices = @transform_0, window_bounds = array<i64: 16, 128>}, {pipeline_mode = #tpu.pipeline_mode<synchronous>, transform_indices = @transform_1, window_bounds = array<i64: 1, 128>}, {pipeline_mode = #tpu.pipeline_mode<synchronous>, transform_indices = @transform_2, window_bounds = array<i64: 1, 128>}]} {
    %c0_i32 = arith.constant 0 : i32
    %0 = arith.cmpi eq, %arg0, %c0_i32 : i32
    %1 = arith.extui %0 : i1 to i32
    %c0_i32_0 = arith.constant 0 : i32
    %2 = arith.cmpi ne, %1, %c0_i32_0 : i32
    scf.if %2 {
      %cst_13 = arith.constant 0x7F800000 : f32
      %28 = vector.broadcast %cst_13 : f32 to vector<1x128xf32>
      %c0_14 = arith.constant 0 : index
      %c0_15 = arith.constant 0 : index
      %29 = vector.load %arg2[%c0_14, %c0_15] : memref<1x128xf32, #tpu.memory_space<vmem>>, vector<1x128xf32>
      tpu.vector_store %arg2[%c0_14, %c0_15], %28 {strides = array<i32>} : memref<1x128xf32, #tpu.memory_space<vmem>>, vector<1x128xf32>,
      %cst_16 = arith.constant 0xFF800000 : f32
      %30 = vector.broadcast %cst_16 : f32 to vector<1x128xf32>
      %c0_17 = arith.constant 0 : index
      %c0_18 = arith.constant 0 : index
      %31 = vector.load %arg3[%c0_17, %c0_18] : memref<1x128xf32, #tpu.memory_space<vmem>>, vector<1x128xf32>
      tpu.vector_store %arg3[%c0_17, %c0_18], %30 {strides = array<i32>} : memref<1x128xf32, #tpu.memory_space<vmem>>, vector<1x128xf32>,
    } else {
    }
    %c0 = arith.constant 0 : index
    %c0_1 = arith.constant 0 : index
    %3 = vector.load %arg1[%c0, %c0_1] : memref<16x128xf32, #tpu.memory_space<vmem>>, vector<16x128xf32>
    %4 = tpu.iota {dimensions = array<i32: 0>} : vector<16x128xi32>
    %5 = tpu.iota {dimensions = array<i32: 1>} : vector<16x128xi32>
    %c16_i32 = arith.constant 16 : i32
    %6 = arith.muli %arg0, %c16_i32 : i32
    %7 = vector.broadcast %6 : i32 to vector<16x128xi32>
    %8 = arith.addi %7, %4 : vector<16x128xi32>
    %c128_i32 = arith.constant 128 : i32
    %9 = vector.broadcast %c128_i32 : i32 to vector<16x128xi32>
    %10 = arith.muli %8, %9 : vector<16x128xi32>
    %11 = arith.addi %10, %5 : vector<16x128xi32>
    %c2048_i32 = arith.constant 2048 : i32
    %12 = vector.broadcast %c2048_i32 : i32 to vector<16x128xi32>
    %13 = arith.cmpi slt, %11, %12 : vector<16x128xi32>
    %cst = arith.constant 0x7F800000 : f32
    %14 = vector.broadcast %cst : f32 to vector<16x128xf32>
    %15 = arith.select %13, %3, %14 : vector<16x128xi1>, vector<16x128xf32>
    %cst_2 = arith.constant 0xFF800000 : f32
    %16 = vector.broadcast %cst_2 : f32 to vector<16x128xf32>
    %17 = arith.select %13, %3, %16 : vector<16x128xi1>, vector<16x128xf32>
    %c0_3 = arith.constant 0 : index
    %c0_4 = arith.constant 0 : index
    %18 = vector.load %arg2[%c0_3, %c0_4] : memref<1x128xf32, #tpu.memory_space<vmem>>, vector<1x128xf32>
    %cst_5 = arith.constant dense<0x7F800000> : vector<128xf32>
    %19 = vector.multi_reduction <minimumf>, %15, %cst_5 [0] : vector<16x128xf32> to vector<128xf32>
    %20 = vector.shape_cast %19 : vector<128xf32> to vector<1x128xf32>
    %21 = arith.minimumf %18, %20 : vector<1x128xf32>
    %c0_6 = arith.constant 0 : index
    %c0_7 = arith.constant 0 : index
    %22 = vector.load %arg2[%c0_6, %c0_7] : memref<1x128xf32, #tpu.memory_space<vmem>>, vector<1x128xf32>
    tpu.vector_store %arg2[%c0_6, %c0_7], %21 {strides = array<i32>} : memref<1x128xf32, #tpu.memory_space<vmem>>, vector<1x128xf32>,
    %c0_8 = arith.constant 0 : index
    %c0_9 = arith.constant 0 : index
    %23 = vector.load %arg3[%c0_8, %c0_9] : memref<1x128xf32, #tpu.memory_space<vmem>>, vector<1x128xf32>
    %cst_10 = arith.constant dense<0xFF800000> : vector<128xf32>
    %24 = vector.multi_reduction <maximumf>, %17, %cst_10 [0] : vector<16x128xf32> to vector<128xf32>
    %25 = vector.shape_cast %24 : vector<128xf32> to vector<1x128xf32>
    %26 = arith.maximumf %23, %25 : vector<1x128xf32>
    %c0_11 = arith.constant 0 : index
    %c0_12 = arith.constant 0 : index
    %27 = vector.load %arg3[%c0_11, %c0_12] : memref<1x128xf32, #tpu.memory_space<vmem>>, vector<1x128xf32>
    tpu.vector_store %arg3[%c0_11, %c0_12], %26 {strides = array<i32>} : memref<1x128xf32, #tpu.memory_space<vmem>>, vector<1x128xf32>,
    return
  }
  func.func @transform_0(%arg0: i32) -> (i32, i32) {
    %c0_i32 = arith.constant 0 : i32
    %c0_i32_0 = arith.constant 0 : i32
    return %arg0, %c0_i32 : i32, i32
  }
  func.func @transform_1(%arg0: i32) -> (i32, i32) {
    %c0_i32 = arith.constant 0 : i32
    %c0_i32_0 = arith.constant 0 : i32
    %c0_i32_1 = arith.constant 0 : i32
    return %c0_i32, %c0_i32_0 : i32, i32
  }
  func.func @transform_2(%arg0: i32) -> (i32, i32) {
    %c0_i32 = arith.constant 0 : i32
    %c0_i32_0 = arith.constant 0 : i32
    %c0_i32_1 = arith.constant 0 : i32
    return %c0_i32, %c0_i32_0 : i32, i32
  }
}

</mosaic_0001>

<bundles_post_ra>
// kernel: _prepare.1
= control target key start
LH: loop header
LB: loop body
LE: loop exit
PB: predicated region body
PF: predicated region fallthrough
CT: control target
= control target key end

     0   :  { %v18_v0 = vlaneseq  ;;  %v67_v1 = vmov inf   ;;  %v68_v2 = vmov -inf   ;;  %s108_s1 = inlined_call_operand.vmem [shape: f32[1,128], index: 1, kind: output, shape index: {0}]   ;;  %s109_s2 = inlined_call_operand.vmem [shape: f32[1,128], index: 2, kind: output, shape index: {1}]   ;;  %s110_s0 = inlined_call_operand.vmem [shape: f32[16,128], index: 0, kind: input, shape index: {}]  }
   0x1   :  { %14 = vst [vmem:[%s108_s1] sm:$0x1] %v67_v1  ;;  %v16_v7 = vld [vmem:[%s110_s0] sm:$0xff]  ;;  %v17_v10 = vld [vmem:[%s110_s0 + $0x8] sm:$0xff] }
   0x2   :  { %15 = vst [vmem:[%s109_s2] sm:$0x1] %v68_v2  ;;  %v19_v3 = vshrl.u32 %v18_v0, 7  ;;  %v22_v4 = vand.u32 127, %v18_v0 }
   0x4   :  { %v20_v5 = vadd.s32 8, %v19_v3  ;;  %v27_v6 = vmul.u32 128, %v19_v3 }
   0x6   :  { %v28_v8 = vmul.u32 128, %v20_v5  ;;  %v29_v9 = vadd.s32 %v27_v6, %v22_v4 }
   0x8   :  { %v30_v11 = vadd.s32 %v28_v8, %v22_v4  ;;  %vm31_vm0 = vcmp.lt.s32.totalorder %v29_v9, 2048  ;;  %v37_v28 = vld [vmem:[%s108_s1] sm:$0x1] }
   0x9   :  { %v33_v12 = vsel %vm31_vm0, %v16_v7, inf  ;;  %v35_v13 = vsel %vm31_vm0, %v16_v7, -inf  ;;  %v47_v29 = vld [vmem:[%s109_s2] sm:$0x1] }
   0xa   :  { %vm32_vm1 = vcmp.lt.s32.totalorder %v30_v11, 2048 }
   0xb   :  { %v34_v14 = vsel %vm32_vm1, %v17_v10, inf  ;;  %v36_v15 = vsel %vm32_vm1, %v17_v10, -inf }
   0xc   :  { %v38_v16 = vmin.f32 %v33_v12, %v34_v14  ;;  %v48_v17 = vmax.f32 %v35_v13, %v36_v15 }
   0xe   :  { %v39_v18 = vrot.slane %v38_v16, 4  ;;  %v49_v19 = vrot.slane %v48_v17, 4 }
  0x10   :  { %v40_v20 = vmin.f32 %v38_v16, %v39_v18  ;;  %v50_v21 = vmax.f32 %v48_v17, %v49_v19 }
  0x12   :  { %v41_v22 = vrot.slane %v40_v20, 2  ;;  %v51_v23 = vrot.slane %v50_v21, 2 }
  0x14   :  { %v42_v24 = vmin.f32 %v40_v20, %v41_v22  ;;  %v52_v25 = vmax.f32 %v50_v21, %v51_v23 }
  0x16   :  { %v43_v26 = vrot.slane %v42_v24, 1  ;;  %v53_v27 = vrot.slane %v52_v25, 1 }
  0x18   :  { %v44_v30 = vmin.f32 %v42_v24, %v43_v26  ;;  %v54_v31 = vmax.f32 %v52_v25, %v53_v27 }
  0x1a   :  { %v45_v32 = vmin.f32 %v37_v28, %v44_v30  ;;  %v55_v33 = vmax.f32 %v47_v29, %v54_v31 }
  0x1c   :  { %46 = vst [vmem:[%s108_s1] sm:$0x1] %v45_v32 }
  0x1d   :  { %56 = vst [vmem:[%s109_s2] sm:$0x1] %v55_v33 }

</bundles_post_ra>
